<compile_context>
chip_gen: v7x
topology: tpu7x:2x2x1
jax: 0.10.0
libtpu: 0.0.40
codegen_flags: <defaults>
</compile_context>

<pallas_src>
import functools
import math

import numpy as np
import jax
import jax.numpy as jnp
from jax.experimental import pallas as pl
from jax.experimental.pallas import tpu as pltpu


def _embednd_kernel(ids_ref, w_ref, phase_ref, out_ref):
    # ids: (T, C) int32; w: (C, W) f32; phase: (1, W) f32; out: (T, W) f32.
    ids = ids_ref[...].astype(jnp.float32)
    w = w_ref[...]
    ang = phase_ref[...]                       # (1, W); broadcasts over rows
    for c in range(ids.shape[1]):              # C = fold*n_axes, tiny -> unrolled
        ang = ang + ids[:, c:c + 1] * w[c:c + 1, :]
    out_ref[...] = jnp.cos(ang)                # cos(theta+phase) == [c,-s,s,c]


def _freq_tables(theta, axes_dim, fold):
    """Host-side tables for the (possibly row-folded) fused layout.

    w     : (fold*n_axes, fold*L) block-diagonal omega table (4x-replicated
            per frequency so lane 4d+k sees omega_d), zeros off-diagonal.
    phase : (1, fold*L) tiled [0, +pi/2, -pi/2, 0] row.
    """
    n_axes = len(axes_dim)
    d2 = sum(axes_dim) // 2
    L = 4 * d2
    w = np.zeros((fold * n_axes, fold * L), dtype=np.float32)
    for j in range(fold):
        off = 0
        for i, ad in enumerate(axes_dim):
            scale = np.arange(0, ad, 2, dtype=np.float64) / ad
            omega = (1.0 / (float(theta) ** scale)).astype(np.float32)
            col0 = j * L + 4 * off
            w[j * n_axes + i, col0:col0 + 4 * (ad // 2)] = np.repeat(omega, 4)
            off += ad // 2
    phase1 = np.tile(np.array([0.0, np.pi / 2, -np.pi / 2, 0.0],
                              dtype=np.float64), d2)
    phase = np.tile(phase1, fold).astype(np.float32)[None, :]
    return jnp.asarray(w), jnp.asarray(phase)


def _pick_tile_rows(rows_f, row_bytes, target_bytes=2 << 20, max_tile=8192):
    """Rows per block: ~2 MiB blocks (VMEM-safe on v5e's 16 MiB scoped default
    even double-buffered), >= 2 blocks when possible for v7x megacore."""
    if rows_f <= 8:
        return rows_f                          # single full block (legal)
    t = (target_bytes // row_bytes) // 8 * 8
    t = max(8, min(max_tile, t))
    rows8 = ((rows_f + 7) // 8) * 8
    t = min(t, rows8)
    if rows_f >= 16 and pl.cdiv(rows_f, t) < 2:
        t = ((-(-rows_f // 2)) + 7) // 8 * 8   # split into >= 2 parallel blocks
    return t


def embed_nd(ids, dim, theta, axes_dim, *, tile_rows=None):
    B, N, n_axes = ids.shape
    assert len(axes_dim) == n_axes and sum(axes_dim) == dim
    assert all(d % 2 == 0 for d in axes_dim)
    d2 = dim // 2
    L = 4 * d2
    rows = B * N

    # Row->lane fold so the output's last dim is a multiple of 128 (unmasked
    # wide stores).  Purely a relabeling: expressed via the host tables.
    fold = 1 if L % 128 == 0 else 128 // math.gcd(L, 128)
    if rows % fold != 0:
        fold = 1                               # fall back to masked stores
    rows_f = rows // fold
    C = fold * n_axes
    W = fold * L

    w, phase = _freq_tables(theta, axes_dim, fold)
    ids_2d = ids.reshape(rows_f, C).astype(jnp.int32)   # contiguous regroup

    if tile_rows is None:
        # Output row (W*4 B) + 128-lane-padded ids row (512 B) per VMEM buffer.
        tile_rows = _pick_tile_rows(rows_f, W * 4 + 512)
    assert tile_rows == rows_f or tile_rows % 8 == 0, \
        "tile_rows must be a multiple of 8 (or the full row count)"
    n_blocks = pl.cdiv(rows_f, tile_rows)      # last block may be partial

    out = pl.pallas_call(
        _embednd_kernel,
        out_shape=jax.ShapeDtypeStruct((rows_f, W), jnp.float32),
        grid=(n_blocks,),
        in_specs=[
            pl.BlockSpec((tile_rows, C), lambda r: (r, 0)),   # ids tile
            pl.BlockSpec((C, W), lambda r: (0, 0)),           # freq table
            pl.BlockSpec((1, W), lambda r: (0, 0)),           # phase row
        ],
        out_specs=pl.BlockSpec((tile_rows, W), lambda r: (r, 0)),
        compiler_params=pltpu.CompilerParams(
            dimension_semantics=("parallel",)),
    )(ids_2d, w, phase)

    # (rows_f, fold*L) -> (B, 1, N, d2, 2, 2): contiguous, metadata-only.
    return out.reshape(B, N, d2, 2, 2)[:, None]


def _reference_embed_nd(ids, dim, theta, axes_dim):
    """Pure-JAX (f32) reference mirroring the PyTorch code."""
    def rope(pos, d, th):
        scale = jnp.arange(0, d, 2, dtype=jnp.float32) / d
        omega = 1.0 / (jnp.asarray(float(th), jnp.float32) ** scale)
        out = jnp.einsum('...n,d->...nd', pos.astype(jnp.float32), omega)
        out = jnp.stack(
            [jnp.cos(out), -jnp.sin(out), jnp.sin(out), jnp.cos(out)], axis=-1)
        return out.reshape(*out.shape[:-1], 2, 2).astype(jnp.float32)

    n_axes = ids.shape[-1]
    emb = jnp.concatenate(
        [rope(ids[..., i], axes_dim[i], theta) for i in range(n_axes)], axis=-3)
    return emb[:, None, ...]


if __name__ == "__main__":
    key = jax.random.PRNGKey(0)
    axes_dim = [8, 8, 16]
    dim = sum(axes_dim)          # 32  -> L = 64 -> fold k = 2 (lane-dense path)
    theta = 10000

    # Case 1: module-scale shapes, exercises the row->lane fold (out 8x128).
    B, N = 2, 8
    ids = jax.random.randint(key, (B, N, len(axes_dim)), 0, 64, dtype=jnp.int32)
    out = jax.block_until_ready(embed_nd(ids, dim, theta, axes_dim))
    assert out.shape == (B, 1, N, dim // 2, 2, 2), out.shape
    assert out.dtype == jnp.float32
    ref = _reference_embed_nd(ids, dim, theta, axes_dim)
    assert jnp.allclose(out, ref, atol=1e-4, rtol=1e-4), \
        float(jnp.max(jnp.abs(out - ref)))

    # Case 2: odd row count (no fold) + non-divisible rows with an explicit
    # small tile -> exercises the masked partial last block (no pad / slice).
    B2, N2 = 1, 333
    ids2 = jax.random.randint(jax.random.PRNGKey(1), (B2, N2, len(axes_dim)),
                              0, 256, dtype=jnp.int32)
    out2 = jax.block_until_ready(
        embed_nd(ids2, dim, theta, axes_dim, tile_rows=64))
    ref2 = _reference_embed_nd(ids2, dim, theta, axes_dim)
    assert out2.shape == ref2.shape, (out2.shape, ref2.shape)
    assert jnp.allclose(out2, ref2, atol=1e-4, rtol=1e-4), \
        float(jnp.max(jnp.abs(out2 - ref2)))

    print("KERNEL_OK")
</pallas_src>

<mosaic_0001>
module attributes {stable_mosaic.version = 11 : i64} {
  func.func @_embednd_kernel(%arg0: i32, %arg1: memref<8x6xi32, #tpu.memory_space<vmem>>, %arg2: memref<6x128xf32, #tpu.memory_space<vmem>>, %arg3: memref<1x128xf32, #tpu.memory_space<vmem>>, %arg4: memref<8x128xf32, #tpu.memory_space<vmem>>) attributes {dimension_semantics = [#tpu.dimension_semantics<parallel>], iteration_bounds = array<i64: 1>, scalar_prefetch = 0 : i64, scratch_operands = 0 : i64, tpu.core_type = #tpu.core_type<tc>, window_params = [{transform_indices = @transform_0, window_bounds = array<i64: 8, 6>}, {pipeline_mode = #tpu.pipeline_mode<synchronous>, transform_indices = @transform_1, window_bounds = array<i64: 6, 128>}, {pipeline_mode = #tpu.pipeline_mode<synchronous>, transform_indices = @transform_2, window_bounds = array<i64: 1, 128>}, {transform_indices = @transform_3, window_bounds = array<i64: 8, 128>}]} {
    %c0 = arith.constant 0 : index
    %c0_0 = arith.constant 0 : index
    %0 = vector.load %arg1[%c0, %c0_0] : memref<8x6xi32, #tpu.memory_space<vmem>>, vector<8x6xi32>
    %1 = arith.sitofp %0 : vector<8x6xi32> to vector<8x6xf32>
    %c0_1 = arith.constant 0 : index
    %c0_2 = arith.constant 0 : index
    %2 = vector.load %arg2[%c0_1, %c0_2] : memref<6x128xf32, #tpu.memory_space<vmem>>, vector<6x128xf32>
    %c0_3 = arith.constant 0 : index
    %c0_4 = arith.constant 0 : index
    %3 = vector.load %arg3[%c0_3, %c0_4] : memref<1x128xf32, #tpu.memory_space<vmem>>, vector<1x128xf32>
    %4 = vector.extract_strided_slice %1 {offsets = [0, 0], sizes = [8, 1], strides = [1, 1]} : vector<8x6xf32> to vector<8x1xf32>
    %5 = vector.extract_strided_slice %2 {offsets = [0, 0], sizes = [1, 128], strides = [1, 1]} : vector<6x128xf32> to vector<1x128xf32>
    %6 = vector.broadcast %4 : vector<8x1xf32> to vector<8x128xf32>
    %7 = vector.broadcast %5 : vector<1x128xf32> to vector<8x128xf32>
    %8 = arith.mulf %6, %7 : vector<8x128xf32>
    %9 = vector.broadcast %3 : vector<1x128xf32> to vector<8x128xf32>
    %10 = arith.addf %9, %8 : vector<8x128xf32>
    %11 = vector.extract_strided_slice %1 {offsets = [0, 1], sizes = [8, 1], strides = [1, 1]} : vector<8x6xf32> to vector<8x1xf32>
    %12 = vector.extract_strided_slice %2 {offsets = [1, 0], sizes = [1, 128], strides = [1, 1]} : vector<6x128xf32> to vector<1x128xf32>
    %13 = vector.broadcast %11 : vector<8x1xf32> to vector<8x128xf32>
    %14 = vector.broadcast %12 : vector<1x128xf32> to vector<8x128xf32>
    %15 = arith.mulf %13, %14 : vector<8x128xf32>
    %16 = arith.addf %10, %15 : vector<8x128xf32>
    %17 = vector.extract_strided_slice %1 {offsets = [0, 2], sizes = [8, 1], strides = [1, 1]} : vector<8x6xf32> to vector<8x1xf32>
    %18 = vector.extract_strided_slice %2 {offsets = [2, 0], sizes = [1, 128], strides = [1, 1]} : vector<6x128xf32> to vector<1x128xf32>
    %19 = vector.broadcast %17 : vector<8x1xf32> to vector<8x128xf32>
    %20 = vector.broadcast %18 : vector<1x128xf32> to vector<8x128xf32>
    %21 = arith.mulf %19, %20 : vector<8x128xf32>
    %22 = arith.addf %16, %21 : vector<8x128xf32>
    %23 = vector.extract_strided_slice %1 {offsets = [0, 3], sizes = [8, 1], strides = [1, 1]} : vector<8x6xf32> to vector<8x1xf32>
    %24 = vector.extract_strided_slice %2 {offsets = [3, 0], sizes = [1, 128], strides = [1, 1]} : vector<6x128xf32> to vector<1x128xf32>
    %25 = vector.broadcast %23 : vector<8x1xf32> to vector<8x128xf32>
    %26 = vector.broadcast %24 : vector<1x128xf32> to vector<8x128xf32>
    %27 = arith.mulf %25, %26 : vector<8x128xf32>
    %28 = arith.addf %22, %27 : vector<8x128xf32>
    %29 = vector.extract_strided_slice %1 {offsets = [0, 4], sizes = [8, 1], strides = [1, 1]} : vector<8x6xf32> to vector<8x1xf32>
    %30 = vector.extract_strided_slice %2 {offsets = [4, 0], sizes = [1, 128], strides = [1, 1]} : vector<6x128xf32> to vector<1x128xf32>
    %31 = vector.broadcast %29 : vector<8x1xf32> to vector<8x128xf32>
    %32 = vector.broadcast %30 : vector<1x128xf32> to vector<8x128xf32>
    %33 = arith.mulf %31, %32 : vector<8x128xf32>
    %34 = arith.addf %28, %33 : vector<8x128xf32>
    %35 = vector.extract_strided_slice %1 {offsets = [0, 5], sizes = [8, 1], strides = [1, 1]} : vector<8x6xf32> to vector<8x1xf32>
    %36 = vector.extract_strided_slice %2 {offsets = [5, 0], sizes = [1, 128], strides = [1, 1]} : vector<6x128xf32> to vector<1x128xf32>
    %37 = vector.broadcast %35 : vector<8x1xf32> to vector<8x128xf32>
    %38 = vector.broadcast %36 : vector<1x128xf32> to vector<8x128xf32>
    %39 = arith.mulf %37, %38 : vector<8x128xf32>
    %40 = arith.addf %34, %39 : vector<8x128xf32>
    %41 = math.cos %40 : vector<8x128xf32>
    %c0_5 = arith.constant 0 : index
    %c0_6 = arith.constant 0 : index
    %42 = vector.load %arg4[%c0_5, %c0_6] : memref<8x128xf32, #tpu.memory_space<vmem>>, vector<8x128xf32>
    tpu.vector_store %arg4[%c0_5, %c0_6], %41 {strides = array<i32>} : memref<8x128xf32, #tpu.memory_space<vmem>>, vector<8x128xf32>,
    return
  }
  func.func @transform_0(%arg0: i32) -> (i32, i32) {
    %c0_i32 = arith.constant 0 : i32
    %c0_i32_0 = arith.constant 0 : i32
    return %arg0, %c0_i32 : i32, i32
  }
  func.func @transform_1(%arg0: i32) -> (i32, i32) {
    %c0_i32 = arith.constant 0 : i32
    %c0_i32_0 = arith.constant 0 : i32
    %c0_i32_1 = arith.constant 0 : i32
    return %c0_i32, %c0_i32_0 : i32, i32
  }
  func.func @transform_2(%arg0: i32) -> (i32, i32) {
    %c0_i32 = arith.constant 0 : i32
    %c0_i32_0 = arith.constant 0 : i32
    %c0_i32_1 = arith.constant 0 : i32
    return %c0_i32, %c0_i32_0 : i32, i32
  }
  func.func @transform_3(%arg0: i32) -> (i32, i32) {
    %c0_i32 = arith.constant 0 : i32
    %c0_i32_0 = arith.constant 0 : i32
    return %arg0, %c0_i32 : i32, i32
  }
}

</mosaic_0001>

<bundles_post_ra>
// kernel: tpu_custom_call.1
= control target key start
LH: loop header
LB: loop body
LE: loop exit
PB: predicated region body
PF: predicated region fallthrough
CT: control target
= control target key end

     0   :  { %8 = vsyncpa [#allocation3], 0  ;;  %s431_s0 = inlined_call_operand.hbm [shape: s32[8,6], index: 0, kind: input, shape index: {}]   ;;  %s432_s1 = inlined_call_operand.hbm [shape: f32[6,128], index: 1, kind: input, shape index: {}]   ;;  %s433_s2 = inlined_call_operand.vmem [shape: f32[1,128], index: 2, kind: input, shape index: {}]   ;;  %s434_s3 = inlined_call_operand.hbm [shape: f32[8,128], index: 3, kind: output, shape index: {}]  }
   0x1   :  { %9 = vsyncpa [#allocation6], 0 }
   0x2   :  { %10 = vsyncpa [#allocation4], 0  ;;  %s336_s12 = smov [#allocation2]   ;;  %s337_s14 = smov [#allocation5]  }
   0x3   :  { %s17_s13 = sshll.u32 %s336_s12, 4  ;;  %s27_s15 = sshll.u32 %s337_s14, 4  ;;  %s18_s13 = int_to_ptr.vmem [resolvable:$true] %s17_s13  ;;  %s28_s15 = int_to_ptr.vmem [resolvable:$true] %s27_s15 }
   0x4   :  { %s264_s18 = scalar_lea.hbm %s431_s0, 128 }
   0x5   :  { %p265_p0 = scmp.ne.s32.totalorder %s431_s0, %s264_s18  ;;  %p268_p1 = scmp.lt.u32.totalorder %s264_s18, %s431_s0 }
   0x7   :  { %p270_p2 = pnand %p268_p1, %p265_p0 }
   0x9   :  { %273 = shalt.err (!%p270_p2)
}
   0xa   :  { %s274_s23 = scalar_lea.vmem %s18_s13, 128  ;;  %p279_p4 = scmp.lt.s32.totalorder %s18_s13, %s18_s13 }
   0xb   :  { %p275_p3 = scmp.ne.s32.totalorder %s18_s13, %s274_s23  ;;  %p280_p5 = scmp.lt.s32.totalorder %s274_s23, %s274_s23 }
   0xd   :  { %p281_p6 = por %p280_p5, %p279_p4 }
   0xf   :  { %p282_p7 = pnand %p281_p6, %p275_p3 }
  0x11   :  { %285 = shalt.err (!%p282_p7)
}
  0x12   :  { %20 = dma.hbm_to_vmem [thread:$0]  %s431_s0, 128, %s18_s13, [#allocation3]  }
  0x13   :  { %s286_s28 = scalar_lea.hbm %s432_s1, 128 }
  0x14   :  { %p287_p8 = scmp.ne.s32.totalorder %s432_s1, %s286_s28  ;;  %p290_p9 = scmp.lt.u32.totalorder %s286_s28, %s432_s1 }
  0x16   :  { %p292_p10 = pnand %p290_p9, %p287_p8 }
  0x18   :  { %295 = shalt.err (!%p292_p10)
}
  0x19   :  { %s296_s6 = scalar_lea.vmem %s28_s15, 128  ;;  %p301_p12 = scmp.lt.s32.totalorder %s28_s15, %s28_s15 }
  0x1a   :  { %p297_p11 = scmp.ne.s32.totalorder %s28_s15, %s296_s6  ;;  %p302_p13 = scmp.lt.s32.totalorder %s296_s6, %s296_s6 }
  0x1c   :  { %p303_p0 = por %p302_p13, %p301_p12 }
  0x1e   :  { %p304_p1 = pnand %p303_p0, %p297_p11 }
  0x20   :  { %307 = shalt.err (!%p304_p1)
}
  0x21   :  { %30 = dma.hbm_to_vmem [thread:$0]  %s432_s1, 128, %s28_s15, [#allocation6]  }
  0x22   :  { %330 = dma.done.wait [#allocation3], 128  }
  0x23   :  { %331 = vsyncadd [#allocation3], 4294967168 }
  0x24   :  { %332 = dma.done.wait [#allocation6], 128  }
  0x25   :  { %333 = vsyncadd [#allocation6], 4294967168  ;;  %v338_v0 = vmov 0   ;;  %v339_v1 = vmov 2   ;;  %v39_v2 = vld [vmem:[#allocation2] sm:$0xff]  ;;  %v340_v4 = vmov 1   ;;  %v48_v8 = vlaneseq }
  0x26   :  { %254 = vset.pattern.permute.xlu0 %v338_v0  ;;  %256 = vset.pattern.permute.xlu1 %v339_v1  ;;  %v40_v3 = vcvt.s32.f32 %v39_v2  ;;  %v341_v5 = vmov 3   ;;  %v342_v6 = vmov 4   ;;  %v343_v7 = vmov 5   ;;  %v41_v11 = vld [vmem:[#allocation5] sm:$0x3f] }
  0x27   :  { %v49_v9 = vshrl.u32 %v48_v8, 7  ;;  %v230_v20 = vld [vmem:[%s433_s2] ss:$0 sm:$0xff]  ;;  %v344_v53 = vmov 2102212464   ;;  %s350_s2 = smov [#allocation7]  }
  0x28   :  { %45 = vperm.xlu0 %254, %v40_v3   ;;  %71 = vperm.xlu1 %256, %v40_v3   ;;  %v345_v55 = vmov 920167782   ;;  %v346_v59 = vmov 1326507024   ;;  %v347_v61 = vmov 683565275  }
  0x29   :  { %v50_v10 = vsub.s32 0, %v49_v9  ;;  %v66_v13 = vsub.s32 1, %v49_v9  ;;  %v76_v15 = vsub.s32 2, %v49_v9  ;;  %v86_v19 = vsub.s32 3, %v49_v9  ;;  %s220_s9 = sshll.u32 %s350_s2, 4  ;;  %s221_s9 = int_to_ptr.vmem [resolvable:$true] %s220_s9 }
  0x2a   :  { %v96_v21 = vsub.s32 4, %v49_v9  ;;  %v106_v23 = vsub.s32 5, %v49_v9  ;;  %v348_v63 = vmov 2475754826   ;;  %v349_v2 = vmov 2131351028   ;;  %p313_p3 = scmp.lt.s32.totalorder %s221_s9, %s221_s9 }
  0x2b   :  { %v51_v12 = vrot.slane %v41_v11, %v50_v10  ;;  %v67_v18 = vrot.slane %v41_v11, %v66_v13  ;;  %v77_v22 = vrot.slane %v41_v11, %v76_v15  ;;  %v87_v28 = vrot.slane %v41_v11, %v86_v19  ;;  %s308_s10 = scalar_lea.vmem %s221_s9, 128 }
  0x2c   :  { %255 = vset.pattern.permute.xlu0 %v340_v4  ;;  %257 = vset.pattern.permute.xlu1 %v341_v5  ;;  %v97_v29 = vrot.slane %v41_v11, %v96_v21  ;;  %v107_v32 = vrot.slane %v41_v11, %v106_v23  ;;  %p309_p2 = scmp.ne.s32.totalorder %s221_s9, %s308_s10  ;;  %p314_p4 = scmp.lt.s32.totalorder %s308_s10, %s308_s10 }
  0x2d   :  { %61 = vperm.xlu0 %255, %v40_v3   ;;  %81 = vperm.xlu1 %257, %v40_v3  }
  0x2e   :  { %p315_p5 = por %p314_p4, %p313_p3 }
  0x30   :  { %p316_p6 = pnand %p315_p5, %p309_p2 }
  0x31   :  { %258 = vset.pattern.permute.xlu1 %v342_v6  ;;  %259 = vset.pattern.permute.xlu0 %v343_v7 }
  0x32   :  { %91 = vperm.xlu1 %258, %v40_v3   ;;  %101 = vperm.xlu0 %259, %v40_v3  }
  0xa7   :  { %v46_v14 = vpop.permute.xlu0 %45  ;;  %v72_v16 = vpop.permute.xlu1 %71 }
  0xa8   :  { %v52_v17 = vmul.f32 %v51_v12, %v46_v14  ;;  %v78_v30 = vmul.f32 %v77_v22, %v72_v16 }
  0xaa   :  { %v59_v26 = vadd.f32 %v230_v20, %v52_v17 }
  0xac   :  { %v62_v24 = vpop.permute.xlu0 %61  ;;  %v82_v25 = vpop.permute.xlu1 %81 }
  0xad   :  { %v68_v27 = vmul.f32 %v67_v18, %v62_v24  ;;  %v88_v34 = vmul.f32 %v87_v28, %v82_v25 }
  0xaf   :  { %v69_v31 = vadd.f32 %v68_v27, %v59_v26 }
  0xb1   :  { %v79_v33 = vadd.f32 %v78_v30, %v69_v31  ;;  %v92_v35 = vpop.permute.xlu1 %91  ;;  %v102_v36 = vpop.permute.xlu0 %101 }
  0xb2   :  { %v98_v37 = vmul.f32 %v97_v29, %v92_v35  ;;  %v108_v39 = vmul.f32 %v107_v32, %v102_v36 }
  0xb3   :  { %v89_v38 = vadd.f32 %v88_v34, %v79_v33 }
  0xb5   :  { %v99_v40 = vadd.f32 %v98_v37, %v89_v38 }
  0xb7   :  { %v398_v41 = vadd.f32 %v108_v39, %v99_v40 }
  0xb9   :  { %v113_v42 = vand.u32 2139095040, %v398_v41  ;;  %v110_v43 = vand.u32 2147483647, %v398_v41  ;;  %vm112_vm7 = vcmp.lt.s32.totalorder %v398_v41, 0  ;;  %vm202_vm12 = vweird.f32 %v398_v41 }
  0xbb   :  { %v114_v44 = vshrl.u32 %v113_v42, 23  ;;  %v117_v46 = vand.u32 8388607, %v110_v43  ;;  %vm111_vm8 = vcmp.le.f32.partialorder %v110_v43, 0.7853982 }
  0xbd   :  { %v231_v45 = vadd.s32 4294967169, %v114_v44  ;;  %v118_v49 = vor.u32 8388608, %v117_v46 }
  0xbf   :  { %v120_v47 = vadd.s32 1, %v231_v45  ;;  %v158_v57 = vshll.u32 %v118_v49, 8 }
  0xc1   :  { %vm121_vm0 = vcmp.gt.s32.totalorder %v120_v47, 0 }
  0xc2   :  { %v122_v48 = vsel %vm121_vm0, %v120_v47, 0 }
  0xc3   :  { %v124_v50 = vand.u32 31, %v122_v48  ;;  %v123_v51 = vshrl.u32 %v122_v48, 5 }
  0xc5   :  { %v125_v52 = vsub.s32 32, %v124_v50  ;;  %v136_v54 = vshll.u32 %v344_v53, %v124_v50  ;;  %v139_v56 = vshll.u32 %v345_v55, %v124_v50  ;;  %v127_v62 = vshll.u32 %v347_v61, %v124_v50 }
  0xc6   :  { %v130_v1 = vshll.u32 %v348_v63, %v124_v50  ;;  %v133_v4 = vshll.u32 %v349_v2, %v124_v50  ;;  %vm145_vm1 = vcmp.lt.s32.totalorder %v123_v51, 4  ;;  %vm142_vm2 = vcmp.lt.s32.totalorder %v123_v51, 1 }
  0xc7   :  { %v137_v58 = vshrl.u32 %v345_v55, %v125_v52  ;;  %v140_v60 = vshrl.u32 %v346_v59, %v125_v52  ;;  %v128_v0 = vshrl.u32 %v348_v63, %v125_v52  ;;  %v131_v3 = vshrl.u32 %v349_v2, %v125_v52 }
  0xc8   :  { %v134_v5 = vshrl.u32 %v344_v53, %v125_v52  ;;  %v126_v9 = vshrl.u32 %v347_v61, %v125_v52  ;;  %vm143_vm3 = vcmp.lt.s32.totalorder %v123_v51, 2  ;;  %vm144_vm4 = vcmp.lt.s32.totalorder %v123_v51, 3 }
  0xc9   :  { %v138_v6 = vor.u32 %v137_v58, %v136_v54  ;;  %v141_v7 = vor.u32 %v140_v60, %v139_v56  ;;  %v129_v8 = vor.u32 %v128_v0, %v127_v62  ;;  %v132_v10 = vor.u32 %v131_v3, %v130_v1 }
  0xca   :  { %v135_v11 = vor.u32 %v134_v5, %v133_v4 }
  0xcb   :  { %v151_v12 = vsel %vm145_vm1, %v138_v6, 920167782  ;;  %v155_v13 = vsel %vm145_vm1, %v141_v7, 1326507024  ;;  %v150_v15 = vsel %vm142_vm2, %v129_v8, %v132_v10  ;;  %v146_v18 = vsel %vm142_vm2, %v126_v9, %v129_v8 }
  0xcc   :  { %v147_v14 = vsel %vm145_vm1, %v135_v11, 2102212464  ;;  %v152_v16 = vsel %vm144_vm4, %v135_v11, %v151_v12  ;;  %v154_v17 = vsel %vm142_vm2, %v132_v10, %v135_v11  ;;  %v156_v21 = vsel %vm144_vm4, %v138_v6, %v155_v13 }
  0xcd   :  { %v148_v19 = vsel %vm144_vm4, %v132_v10, %v147_v14  ;;  %v153_v20 = vsel %vm143_vm3, %v150_v15, %v152_v16  ;;  %v157_v22 = vsel %vm143_vm3, %v154_v17, %v156_v21 }
  0xce   :  { %v404_v23 = vmul.u32.u64.low %v158_v57, %v153_v20  ;;  %v405_v24 = vmul.u32.u64.high %v158_v57, %v153_v20, %v404_v23  ;;  %v407_v25 = vmul.u32.u64.low %v158_v57, %v157_v22  ;;  %v408_v26 = vmul.u32.u64.high %v158_v57, %v157_v22, %v407_v25 }
  0xcf   :  { %v149_v27 = vsel %vm143_vm3, %v146_v18, %v148_v19 }
  0xd0   :  { %v168_v28 = vadd.s32 1, %v405_v24  ;;  %v165_v29 = vmul.u32 %v158_v57, %v149_v27  ;;  %vm167_vm5 = vc.u32 %v408_v26, %v404_v23  ;;  %v166_v42 = vadd.s32 %v404_v23, %v408_v26 }
  0xd2   :  { %v169_v30 = vsel %vm167_vm5, %v168_v28, %v405_v24 }
  0xd3   :  { %v170_v31 = vadd.s32 %v169_v30, %v165_v29 }
  0xd5   :  { %v171_v32 = vadd.s32 536870912, %v170_v31 }
  0xd7   :  { %v172_v33 = vshrl.u32 %v171_v32, 30 }
  0xd9   :  { %v173_v34 = vshll.u32 %v172_v33, 30  ;;  %v196_v57 = vsub.s32 4, %v172_v33 }
  0xdb   :  { %v174_v35 = vsub.s32 %v170_v31, %v173_v34  ;;  %v197_v59 = vsel %vm112_vm7, %v196_v57, %v172_v33 }
  0xdc   :  { %v199_v60 = vsel %vm111_vm8, 0, %v197_v59 }
  0xdd   :  { %v176_v36 = vsub.s32 0, %v174_v35  ;;  %v203_v61 = vand.u32 3, %v199_v60 }
  0xdf   :  { %v232_v37 = vmin.u32 %v176_v36, %v174_v35  ;;  %vm208_vm9 = vcmp.eq.s32.totalorder %v203_v61, 2  ;;  %vm205_vm10 = vcmp.eq.s32.totalorder %v203_v61, 0  ;;  %vm204_vm11 = vcmp.lt.s32.totalorder %v203_v61, 2 }
  0xe1   :  { %v178_v38 = vclz %v232_v37 }
  0xe3   :  { %v233_v39 = vadd.s32 4294967294, %v178_v38 }
  0xe5   :  { %vm234_vm6 = vcmp.lt.s32.totalorder %v233_v39, 0 }
  0xe6   :  { %v181_v40 = vsel %vm234_vm6, 0, %v233_v39 }
  0xe7   :  { %v182_v44 = vsub.s32 32, %v181_v40  ;;  %v186_v45 = vsub.s32 4294967266, %v181_v40  ;;  %v183_v46 = vshll.u32 %v174_v35, %v181_v40 }
  0xe9   :  { %v184_v47 = vshrl.u32 %v166_v42, %v182_v44  ;;  %v187_v48 = vadd.s32 127, %v186_v45 }
  0xeb   :  { %v185_v49 = vor.u32 %v184_v47, %v183_v46  ;;  %v188_v50 = vshll.u32 %v187_v48, 23 }
  0xed   :  { %v189_v51 = vor.u32 4788187, %v188_v50  ;;  %v192_v53 = vcvt.s32.f32 %v185_v49 }
  0xef   :  { %v190_v52 = vand.u32 2147483647, %v189_v51 }
  0xf1   :  { %v193_v54 = vmul.f32 %v192_v53, %v190_v52 }
  0xf3   :  { %v194_v55 = vxor.u32 2147483648, %v193_v54 }
  0xf5   :  { %v195_v56 = vsel %vm112_vm7, %v194_v55, %v193_v54 }
  0xf6   :  { %v198_v58 = vsel %vm111_vm8, %v398_v41, %v195_v56 }
  0xf7   :  { %260 = vcosq.f32 %v198_v58 }
  0xf8   :  { %262 = vsinq.f32 %v198_v58 }
 0x101   :  { %v261_v62 = vpop.eup %260 }
 0x102   :  { %v263_v63 = vpop.eup %262  ;;  %v209_v0 = vxor.u32 2147483648, %v261_v62 }
 0x103   :  { %v206_v1 = vxor.u32 2147483648, %v263_v63 }
 0x104   :  { %v210_v2 = vsel %vm208_vm9, %v209_v0, %v263_v63 }
 0x105   :  { %v207_v43 = vsel %vm205_vm10, %v261_v62, %v206_v1 }
 0x106   :  { %v211_v3 = vsel %vm204_vm11, %v207_v43, %v210_v2 }
 0x107   :  { %v212_v4 = vsel %vm202_vm12, nan, %v211_v3 }
 0x108   :  { %213 = vst [vmem:[#allocation7] sm:$0xff] %v212_v4 }
 0x109   :  { %319 = shalt.err (!%p316_p6)
}
 0x10a   :  { %s320_s13 = scalar_lea.hbm %s434_s3, 128 }
 0x10b   :  { %p321_p7 = scmp.ne.s32.totalorder %s434_s3, %s320_s13  ;;  %p324_p8 = scmp.lt.u32.totalorder %s320_s13, %s434_s3 }
 0x10d   :  { %p326_p9 = pnand %p324_p8, %p321_p7 }
 0x10f   :  { %329 = shalt.err (!%p326_p9)
}
 0x110   :  { %223 = dma.vmem_to_hbm [thread:$0]  %s221_s9, 128, %s434_s3, [#allocation4]  }
 0x111   :  { %334 = dma.done.wait [#allocation4], 128  }
 0x112   :  { %335 = vsyncadd [#allocation4], 4294967168 }
 0x113   :  { %227 = vsyncpa [#allocation3], 1 }
 0x114   :  { %228 = vsyncpa [#allocation6], 1 }
 0x115   :  { %229 = vsyncpa [#allocation4], 1 }

</bundles_post_ra>
